<compile_context>
chip_gen: v6e
topology: v6e:2x2x1
jax: 0.10.0
libtpu: 0.0.40
codegen_flags: <defaults>
</compile_context>

<pallas_src>
import functools

import jax
import jax.numpy as jnp
from jax.experimental import pallas as pl
from jax.experimental.pallas import tpu as pltpu

EMB_DIM = 50  # matches nn.Embedding(prefix, 50)


def _round_up(x: int, m: int) -> int:
    return ((x + m - 1) // m) * m


def prepare_prefix_table(prefix_weight):
    """Pad the embedding table once (at init) to a lane/sublane-dense block.

    rows -> multiple of 8 (sublanes), cols -> multiple of 128 (lanes).
    Keep the parameter in this layout so the per-step forward does zero
    table re-padding work.
    """
    num_rows, d = prefix_weight.shape
    k_pad = _round_up(max(num_rows, 1), 8)
    d_pad = _round_up(d, 128)
    table = jnp.zeros((k_pad, d_pad), prefix_weight.dtype)
    table = table.at[:num_rows, :d].set(prefix_weight)
    return table


def _gather_kernel(idx_sm, table_ref, out_ref, *, tb, batch, num_rows):
    # idx_sm   : (B,)          int32  scalar-prefetched prefix indices in SMEM
    # table_ref: (K_pad, D_pad) f32   VMEM-resident padded embedding table
    # out_ref  : (TB, D_pad)    f32   lane-dense output tile
    base = pl.program_id(0) * tb

    def body(r, carry):
        # Clamp the global row for the padded tail of the last tile (those
        # rows are sliced off by the wrapper; clamping avoids OOB SMEM reads).
        row = jnp.minimum(base + r, batch - 1)
        k = idx_sm[row]
        # TODO(synk): nn.Embedding raises on out-of-range indices; we clamp.
        k = jnp.clip(k, 0, num_rows - 1)
        out_ref[pl.ds(r, 1), :] = table_ref[pl.ds(k, 1), :]
        return carry

    jax.lax.fori_loop(0, tb, body, 0, unroll=tb <= 16)


def embedding_dot_forward(cats, conts, table_padded, *, num_rows, emb_dim=EMB_DIM):
    """Pallas implementation of EmbeddingDot.forward(cats, conts).

    `table_padded` is the pre-padded (K_pad, 128) table from prepare_prefix_table.
    """
    del conts  # unused by the module's forward, kept for signature parity

    idx = cats[:, 0].astype(jnp.int32)  # prefix = cats[:, 0]
    batch = idx.shape[0]
    k_pad, d_pad = table_padded.shape
    itemsize = jnp.dtype(table_padded.dtype).itemsize

    # Batch tile: big (amortizes per-grid-step overhead), multiple of 8,
    # capped at 512; for batch >= 16 keep >= 2 grid steps so the v7x megacore
    # can shard the "parallel" batch axis across both TensorCores.
    tb = min(512, _round_up(batch, 8))
    if batch >= 16:
        tb = min(tb, _round_up(pl.cdiv(batch, 2), 8))
    grid_len = pl.cdiv(batch, tb)
    b_pad = grid_len * tb

    kernel = functools.partial(
        _gather_kernel, tb=tb, batch=batch, num_rows=num_rows
    )

    # Explicit VMEM budget: resident table (double-buffered by the pipeliner)
    # + double-buffered output tiles + headroom.  Capped at 64 MiB (v7x/TC).
    table_bytes = k_pad * d_pad * itemsize
    out_tile_bytes = tb * d_pad * itemsize
    vmem_limit = int(
        min(64 * 1024 * 1024,
            max(32 * 1024 * 1024,
                2 * table_bytes + 4 * out_tile_bytes + (2 << 20)))
    )

    cost = pl.CostEstimate(
        flops=0,
        transcendentals=0,
        bytes_accessed=batch * 4 + table_bytes + b_pad * d_pad * itemsize,
    )

    out = pl.pallas_call(
        kernel,
        out_shape=jax.ShapeDtypeStruct((b_pad, d_pad), table_padded.dtype),
        grid_spec=pltpu.PrefetchScalarGridSpec(
            num_scalar_prefetch=1,          # indices -> SMEM
            grid=(grid_len,),
            in_specs=[
                # whole padded table, same block every step -> stays resident
                pl.BlockSpec((k_pad, d_pad), lambda i, idx_ref: (0, 0)),
            ],
            out_specs=pl.BlockSpec((tb, d_pad), lambda i, idx_ref: (i, 0)),
        ),
        compiler_params=pltpu.CompilerParams(
            # each output block written exactly once -> parallel-legal
            dimension_semantics=("parallel",),
            vmem_limit_bytes=vmem_limit,
        ),
        cost_estimate=cost,
    )(idx, table_padded)

    # Single slice at the module boundary (batch tail + 128 -> emb_dim lanes).
    return out[:batch, :emb_dim]


if __name__ == "__main__":
    key = jax.random.PRNGKey(0)
    k_w, k_cat, k_cont = jax.random.split(key, 3)

    num_prefix = 20     # vocabulary size of the 'Prefix' categorical column
    batch = 8
    n_cat = 3
    n_cont = 5

    # Deterministic init matching `self.prefix.weight.data.uniform_(0, 0.05)`
    prefix_weight = jax.random.uniform(
        k_w, (num_prefix, EMB_DIM), dtype=jnp.float32, minval=0.0, maxval=0.05
    )

    cats = jax.random.randint(k_cat, (batch, n_cat), 0, num_prefix, dtype=jnp.int32)
    conts = jax.random.normal(k_cont, (batch, n_cont), dtype=jnp.float32)

    # Pad the table ONCE at "init", not per forward call.
    table_padded = prepare_prefix_table(prefix_weight)

    fwd = jax.jit(embedding_dot_forward, static_argnames=("num_rows", "emb_dim"))
    out = fwd(cats, conts, table_padded, num_rows=num_prefix, emb_dim=EMB_DIM)
    out = jax.block_until_ready(out)

    # Reference check (plain JAX gather) — copy gather must be bit-exact.
    ref = jnp.take(prefix_weight, cats[:, 0], axis=0)
    assert out.shape == (batch, EMB_DIM)
    assert out.dtype == jnp.float32
    assert jnp.array_equal(out, ref), "Pallas embedding gather mismatch"

    print("KERNEL_OK")
</pallas_src>

<mosaic_0001>
module attributes {stable_mosaic.version = 11 : i64} {
  func.func @_gather_kernel(%arg0: i32, %arg1: memref<8xi32, #tpu.memory_space<smem>>, %arg2: memref<24x128xf32, #tpu.memory_space<vmem>>, %arg3: memref<8x128xf32, #tpu.memory_space<vmem>>) attributes {dimension_semantics = [#tpu.dimension_semantics<parallel>], iteration_bounds = array<i64: 1>, scalar_prefetch = 1 : i64, scratch_operands = 0 : i64, tpu.core_type = #tpu.core_type<tc>, window_params = [{pipeline_mode = #tpu.pipeline_mode<synchronous>, transform_indices = @transform_0, window_bounds = array<i64: 24, 128>}, {transform_indices = @transform_1, window_bounds = array<i64: 8, 128>}]} {
    %c8_i32 = arith.constant 8 : i32
    %0 = arith.muli %arg0, %c8_i32 : i32
    %c0_i32 = arith.constant 0 : i32
    %1 = arith.addi %0, %c0_i32 : i32
    %c7_i32 = arith.constant 7 : i32
    %2 = arith.minsi %1, %c7_i32 : i32
    %3 = arith.index_cast %2 : i32 to index
    %4 = memref.load %arg1[%3] : memref<8xi32, #tpu.memory_space<smem>>
    %c0_i32_0 = arith.constant 0 : i32
    %c19_i32 = arith.constant 19 : i32
    %5 = arith.maxsi %c0_i32_0, %4 : i32
    %6 = arith.minsi %c19_i32, %5 : i32
    %7 = arith.index_cast %6 : i32 to index
    %c0 = arith.constant 0 : index
    %8 = vector.load %arg2[%7, %c0] : memref<24x128xf32, #tpu.memory_space<vmem>>, vector<1x128xf32>
    %9 = arith.index_cast %c0_i32 : i32 to index
    %c0_1 = arith.constant 0 : index
    %10 = vector.load %arg3[%9, %c0_1] : memref<8x128xf32, #tpu.memory_space<vmem>>, vector<1x128xf32>
    tpu.vector_store %arg3[%9, %c0_1], %8 {strides = array<i32>} : memref<8x128xf32, #tpu.memory_space<vmem>>, vector<1x128xf32>,
    %c1_i32 = arith.constant 1 : i32
    %11 = arith.addi %0, %c1_i32 : i32
    %c7_i32_2 = arith.constant 7 : i32
    %12 = arith.minsi %11, %c7_i32_2 : i32
    %13 = arith.index_cast %12 : i32 to index
    %14 = memref.load %arg1[%13] : memref<8xi32, #tpu.memory_space<smem>>
    %c0_i32_3 = arith.constant 0 : i32
    %c19_i32_4 = arith.constant 19 : i32
    %15 = arith.maxsi %c0_i32_3, %14 : i32
    %16 = arith.minsi %c19_i32_4, %15 : i32
    %17 = arith.index_cast %16 : i32 to index
    %c0_5 = arith.constant 0 : index
    %18 = vector.load %arg2[%17, %c0_5] : memref<24x128xf32, #tpu.memory_space<vmem>>, vector<1x128xf32>
    %19 = arith.index_cast %c1_i32 : i32 to index
    %c0_6 = arith.constant 0 : index
    %20 = vector.load %arg3[%19, %c0_6] : memref<8x128xf32, #tpu.memory_space<vmem>>, vector<1x128xf32>
    tpu.vector_store %arg3[%19, %c0_6], %18 {strides = array<i32>} : memref<8x128xf32, #tpu.memory_space<vmem>>, vector<1x128xf32>,
    %c2_i32 = arith.constant 2 : i32
    %21 = arith.addi %0, %c2_i32 : i32
    %c7_i32_7 = arith.constant 7 : i32
    %22 = arith.minsi %21, %c7_i32_7 : i32
    %23 = arith.index_cast %22 : i32 to index
    %24 = memref.load %arg1[%23] : memref<8xi32, #tpu.memory_space<smem>>
    %c0_i32_8 = arith.constant 0 : i32
    %c19_i32_9 = arith.constant 19 : i32
    %25 = arith.maxsi %c0_i32_8, %24 : i32
    %26 = arith.minsi %c19_i32_9, %25 : i32
    %27 = arith.index_cast %26 : i32 to index
    %c0_10 = arith.constant 0 : index
    %28 = vector.load %arg2[%27, %c0_10] : memref<24x128xf32, #tpu.memory_space<vmem>>, vector<1x128xf32>
    %29 = arith.index_cast %c2_i32 : i32 to index
    %c0_11 = arith.constant 0 : index
    %30 = vector.load %arg3[%29, %c0_11] : memref<8x128xf32, #tpu.memory_space<vmem>>, vector<1x128xf32>
    tpu.vector_store %arg3[%29, %c0_11], %28 {strides = array<i32>} : memref<8x128xf32, #tpu.memory_space<vmem>>, vector<1x128xf32>,
    %c3_i32 = arith.constant 3 : i32
    %31 = arith.addi %0, %c3_i32 : i32
    %c7_i32_12 = arith.constant 7 : i32
    %32 = arith.minsi %31, %c7_i32_12 : i32
    %33 = arith.index_cast %32 : i32 to index
    %34 = memref.load %arg1[%33] : memref<8xi32, #tpu.memory_space<smem>>
    %c0_i32_13 = arith.constant 0 : i32
    %c19_i32_14 = arith.constant 19 : i32
    %35 = arith.maxsi %c0_i32_13, %34 : i32
    %36 = arith.minsi %c19_i32_14, %35 : i32
    %37 = arith.index_cast %36 : i32 to index
    %c0_15 = arith.constant 0 : index
    %38 = vector.load %arg2[%37, %c0_15] : memref<24x128xf32, #tpu.memory_space<vmem>>, vector<1x128xf32>
    %39 = arith.index_cast %c3_i32 : i32 to index
    %c0_16 = arith.constant 0 : index
    %40 = vector.load %arg3[%39, %c0_16] : memref<8x128xf32, #tpu.memory_space<vmem>>, vector<1x128xf32>
    tpu.vector_store %arg3[%39, %c0_16], %38 {strides = array<i32>} : memref<8x128xf32, #tpu.memory_space<vmem>>, vector<1x128xf32>,
    %c4_i32 = arith.constant 4 : i32
    %41 = arith.addi %0, %c4_i32 : i32
    %c7_i32_17 = arith.constant 7 : i32
    %42 = arith.minsi %41, %c7_i32_17 : i32
    %43 = arith.index_cast %42 : i32 to index
    %44 = memref.load %arg1[%43] : memref<8xi32, #tpu.memory_space<smem>>
    %c0_i32_18 = arith.constant 0 : i32
    %c19_i32_19 = arith.constant 19 : i32
    %45 = arith.maxsi %c0_i32_18, %44 : i32
    %46 = arith.minsi %c19_i32_19, %45 : i32
    %47 = arith.index_cast %46 : i32 to index
    %c0_20 = arith.constant 0 : index
    %48 = vector.load %arg2[%47, %c0_20] : memref<24x128xf32, #tpu.memory_space<vmem>>, vector<1x128xf32>
    %49 = arith.index_cast %c4_i32 : i32 to index
    %c0_21 = arith.constant 0 : index
    %50 = vector.load %arg3[%49, %c0_21] : memref<8x128xf32, #tpu.memory_space<vmem>>, vector<1x128xf32>
    tpu.vector_store %arg3[%49, %c0_21], %48 {strides = array<i32>} : memref<8x128xf32, #tpu.memory_space<vmem>>, vector<1x128xf32>,
    %c5_i32 = arith.constant 5 : i32
    %51 = arith.addi %0, %c5_i32 : i32
    %c7_i32_22 = arith.constant 7 : i32
    %52 = arith.minsi %51, %c7_i32_22 : i32
    %53 = arith.index_cast %52 : i32 to index
    %54 = memref.load %arg1[%53] : memref<8xi32, #tpu.memory_space<smem>>
    %c0_i32_23 = arith.constant 0 : i32
    %c19_i32_24 = arith.constant 19 : i32
    %55 = arith.maxsi %c0_i32_23, %54 : i32
    %56 = arith.minsi %c19_i32_24, %55 : i32
    %57 = arith.index_cast %56 : i32 to index
    %c0_25 = arith.constant 0 : index
    %58 = vector.load %arg2[%57, %c0_25] : memref<24x128xf32, #tpu.memory_space<vmem>>, vector<1x128xf32>
    %59 = arith.index_cast %c5_i32 : i32 to index
    %c0_26 = arith.constant 0 : index
    %60 = vector.load %arg3[%59, %c0_26] : memref<8x128xf32, #tpu.memory_space<vmem>>, vector<1x128xf32>
    tpu.vector_store %arg3[%59, %c0_26], %58 {strides = array<i32>} : memref<8x128xf32, #tpu.memory_space<vmem>>, vector<1x128xf32>,
    %c6_i32 = arith.constant 6 : i32
    %61 = arith.addi %0, %c6_i32 : i32
    %c7_i32_27 = arith.constant 7 : i32
    %62 = arith.minsi %61, %c7_i32_27 : i32
    %63 = arith.index_cast %62 : i32 to index
    %64 = memref.load %arg1[%63] : memref<8xi32, #tpu.memory_space<smem>>
    %c0_i32_28 = arith.constant 0 : i32
    %c19_i32_29 = arith.constant 19 : i32
    %65 = arith.maxsi %c0_i32_28, %64 : i32
    %66 = arith.minsi %c19_i32_29, %65 : i32
    %67 = arith.index_cast %66 : i32 to index
    %c0_30 = arith.constant 0 : index
    %68 = vector.load %arg2[%67, %c0_30] : memref<24x128xf32, #tpu.memory_space<vmem>>, vector<1x128xf32>
    %69 = arith.index_cast %c6_i32 : i32 to index
    %c0_31 = arith.constant 0 : index
    %70 = vector.load %arg3[%69, %c0_31] : memref<8x128xf32, #tpu.memory_space<vmem>>, vector<1x128xf32>
    tpu.vector_store %arg3[%69, %c0_31], %68 {strides = array<i32>} : memref<8x128xf32, #tpu.memory_space<vmem>>, vector<1x128xf32>,
    %c7_i32_32 = arith.constant 7 : i32
    %71 = arith.addi %0, %c7_i32_32 : i32
    %c7_i32_33 = arith.constant 7 : i32
    %72 = arith.minsi %71, %c7_i32_33 : i32
    %73 = arith.index_cast %72 : i32 to index
    %74 = memref.load %arg1[%73] : memref<8xi32, #tpu.memory_space<smem>>
    %c0_i32_34 = arith.constant 0 : i32
    %c19_i32_35 = arith.constant 19 : i32
    %75 = arith.maxsi %c0_i32_34, %74 : i32
    %76 = arith.minsi %c19_i32_35, %75 : i32
    %77 = arith.index_cast %76 : i32 to index
    %c0_36 = arith.constant 0 : index
    %78 = vector.load %arg2[%77, %c0_36] : memref<24x128xf32, #tpu.memory_space<vmem>>, vector<1x128xf32>
    %79 = arith.index_cast %c7_i32_32 : i32 to index
    %c0_37 = arith.constant 0 : index
    %80 = vector.load %arg3[%79, %c0_37] : memref<8x128xf32, #tpu.memory_space<vmem>>, vector<1x128xf32>
    tpu.vector_store %arg3[%79, %c0_37], %78 {strides = array<i32>} : memref<8x128xf32, #tpu.memory_space<vmem>>, vector<1x128xf32>,
    %c8_i32_38 = arith.constant 8 : i32
    return
  }
  func.func @transform_0(%arg0: i32, %arg1: memref<8xi32, #tpu.memory_space<smem>>) -> (i32, i32) {
    %c0_i32 = arith.constant 0 : i32
    %c0_i32_0 = arith.constant 0 : i32
    %c0_i32_1 = arith.constant 0 : i32
    return %c0_i32, %c0_i32_0 : i32, i32
  }
  func.func @transform_1(%arg0: i32, %arg1: memref<8xi32, #tpu.memory_space<smem>>) -> (i32, i32) {
    %c0_i32 = arith.constant 0 : i32
    %c0_i32_0 = arith.constant 0 : i32
    return %arg0, %c0_i32 : i32, i32
  }
}

</mosaic_0001>

<bundles_post_ra>
// kernel: embedding_dot_forward.1
= control target key start
LH: loop header
LB: loop body
LE: loop exit
PB: predicated region body
PF: predicated region fallthrough
CT: control target
= control target key end

     0   :  { %s306_s0 = inlined_call_operand.vmem [shape: s32[8], index: 0, kind: input, shape index: {}]   ;;  %s307_s1 = inlined_call_operand.hbm [shape: f32[24,128], index: 1, kind: input, shape index: {}]   ;;  %s308_s2 = inlined_call_operand.hbm [shape: f32[8,128], index: 2, kind: output, shape index: {}]  }
   0x1   :  { %s7_s11 = sshll.u32 %s306_s0, 4  ;;  %s8_s11 = int_to_ptr.vmem [resolvable:$true] %s7_s11 }
   0x2   :  { %s209_s12 = scalar_lea.vmem %s8_s11, 16  ;;  %p214_p1 = scmp.lt.s32.totalorder %s8_s11, %s8_s11 }
   0x3   :  { %p210_p0 = scmp.ne.s32.totalorder %s8_s11, %s209_s12  ;;  %p215_p2 = scmp.lt.s32.totalorder %s209_s12, %s209_s12 }
   0x5   :  { %p216_p3 = por %p215_p2, %p214_p1 }
   0x7   :  { %p217_p4 = pnand %p216_p3, %p210_p0 }
   0x9   :  { %220 = shalt.err (!%p217_p4)  }
   0xa   :  { %s267_s13 = smov [#allocation3]  }
   0xb   :  { %10 = dma.vmem_to_smem %s8_s11, 16, %s267_s13, [#allocation2] }
   0xc   :  { %261 = dma.done.wait [#allocation2], 16 }
   0xd   :  { %262 = vsyncadd [#allocation2], 4294967280 }
   0xe   :  { %12 = sfence }
   0xf   :  { %13 = vsyncpa [#allocation5], 0 }
  0x10   :  { %14 = vsyncpa [#allocation6], 0  ;;  %s268_s14 = smov [#allocation4]  }
  0x11   :  { %s20_s15 = sshll.u32 %s268_s14, 4  ;;  %s21_s15 = int_to_ptr.vmem [resolvable:$true] %s20_s15 }
  0x12   :  { %s229_s16 = scalar_lea.vmem %s21_s15, 384  ;;  %p234_p6 = scmp.lt.s32.totalorder %s21_s15, %s21_s15 }
  0x13   :  { %p230_p5 = scmp.ne.s32.totalorder %s21_s15, %s229_s16  ;;  %p235_p7 = scmp.lt.s32.totalorder %s229_s16, %s229_s16 }
  0x15   :  { %p236_p8 = por %p235_p7, %p234_p6 }
  0x17   :  { %p237_p9 = pnand %p236_p8, %p230_p5 }
  0x19   :  { %240 = shalt.err (!%p237_p9)
}
  0x1a   :  { %s269_s0 = smov 128   ;;  %s270_s17 = smov 8  }
  0x1b   :  { %26 = dma.hbm_to_vmem [thread:$0]  %s307_s1, 384, %s21_s15, [#allocation5], %s269_s0, %s269_s0, %s270_s17  }
  0x1c   :  { %263 = dma.done.wait [#allocation5], 384  }
  0x1d   :  { %264 = vsyncadd [#allocation5], 4294966912  ;;  %s33_s20 = sld [smem:[#allocation3]]  ;;  %s271_s6 = smov [#allocation7]  }
  0x1e   :  { %s146_s21 = sld [smem:[#allocation3 + $0x1]]  ;;  %s124_s7 = sshll.u32 %s271_s6, 4  ;;  %s125_s7 = int_to_ptr.vmem [resolvable:$true] %s124_s7 }
  0x1f   :  { %s152_s22 = sld [smem:[#allocation3 + $0x2]]  ;;  %s241_s10 = scalar_lea.vmem %s125_s7, 128 }
  0x20   :  { %s158_s23 = sld [smem:[#allocation3 + $0x3]] }
  0x21   :  { %s293_s24 = sld [smem:[#allocation3 + $0x4]] }
  0x22   :  { %s295_s25 = sld [smem:[#allocation3 + $0x5]] }
  0x23   :  { %p34_p10 = scmp.gt.s32.totalorder %s33_s20, 0  ;;  %p141_p11 = scmp.lt.s32.totalorder %s33_s20, 19 }
  0x24   :  { %p45_p12 = scmp.gt.s32.totalorder %s146_s21, 0  ;;  %p147_p13 = scmp.lt.s32.totalorder %s146_s21, 19 }
  0x25   :  { %s310_s20 = smov (!%p34_p10, %s33_s20), 0  ;;  %p56_p0 = scmp.gt.s32.totalorder %s152_s22, 0 }
  0x26   :  { %s312_s21 = smov (!%p45_p12, %s146_s21), 0  ;;  %s314_s20 = smov (!%p141_p11, %s310_s20), 19 }
  0x27   :  { %s316_s21 = smov (!%p147_p13, %s312_s21), 19  ;;  %s38_s1 = scalar_lea.vmem [#allocation4], %s314_s20 }
  0x28   :  { %v39_v0 = vld [vmem:[%s38_s1] sm:$0x1]  ;;  %p153_p1 = scmp.lt.s32.totalorder %s152_s22, 19  ;;  %s49_s26 = scalar_lea.vmem [#allocation4], %s316_s21 }
  0x29   :  { %40 = vst [vmem:[#allocation7] sm:$0x1] %v39_v0  ;;  %v50_v1 = vld [vmem:[%s49_s26] sm:$0x1]  ;;  %s318_s22 = smov (!%p56_p0, %s152_s22), 0  ;;  %p67_p2 = scmp.gt.s32.totalorder %s158_s23, 0 }
  0x2a   :  { %51 = vst [vmem:[#allocation7 + $0x1] sm:$0x1] %v50_v1  ;;  %p159_p3 = scmp.lt.s32.totalorder %s158_s23, 19  ;;  %s320_s22 = smov (!%p153_p1, %s318_s22), 19 }
  0x2b   :  { %s322_s23 = smov (!%p67_p2, %s158_s23), 0  ;;  %p78_p4 = scmp.gt.s32.totalorder %s293_s24, 0 }
  0x2c   :  { %s60_s27 = scalar_lea.vmem [#allocation4], %s320_s22  ;;  %s324_s23 = smov (!%p159_p3, %s322_s23), 19 }
  0x2d   :  { %v61_v2 = vld [vmem:[%s60_s27] sm:$0x1]  ;;  %s79_s28 = scalar_select %p78_p4, %s293_s24, 0 }
  0x2e   :  { %62 = vst [vmem:[#allocation7 + $0x2] sm:$0x1] %v61_v2  ;;  %p165_p5 = scmp.lt.s32.totalorder %s293_s24, 19  ;;  %s71_s29 = scalar_lea.vmem [#allocation4], %s324_s23 }
  0x2f   :  { %v72_v3 = vld [vmem:[%s71_s29] sm:$0x1]  ;;  %p89_p6 = scmp.gt.s32.totalorder %s295_s25, 0  ;;  %p171_p7 = scmp.lt.s32.totalorder %s295_s25, 19 }
  0x30   :  { %73 = vst [vmem:[#allocation7 + $0x3] sm:$0x1] %v72_v3  ;;  %s326_s28 = smov (!%p165_p5, %s79_s28), 19  ;;  %s176_s30 = sld [smem:[#allocation3 + $0x6]] }
  0x31   :  { %s328_s25 = smov (!%p89_p6, %s295_s25), 0  ;;  %s82_s3 = scalar_lea.vmem [#allocation4], %s326_s28 }
  0x32   :  { %v83_v4 = vld [vmem:[%s82_s3] sm:$0x1]  ;;  %s330_s25 = smov (!%p171_p7, %s328_s25), 19  ;;  %s182_s4 = sld [smem:[#allocation3 + $0x7]] }
  0x33   :  { %84 = vst [vmem:[#allocation7 + $0x4] sm:$0x1] %v83_v4  ;;  %s93_s5 = scalar_lea.vmem [#allocation4], %s330_s25  ;;  %p242_p12 = scmp.ne.s32.totalorder %s125_s7, %s241_s10 }
  0x34   :  { %v94_v5 = vld [vmem:[%s93_s5] sm:$0x1]  ;;  %p246_p13 = scmp.lt.s32.totalorder %s125_s7, %s125_s7  ;;  %p247_p0 = scmp.lt.s32.totalorder %s241_s10, %s241_s10 }
  0x35   :  { %95 = vst [vmem:[#allocation7 + $0x5] sm:$0x1] %v94_v5 }
  0x36   :  { %p100_p8 = scmp.gt.s32.totalorder %s176_s30, 0  ;;  %p177_p9 = scmp.lt.s32.totalorder %s176_s30, 19 }
  0x37   :  { %p248_p1 = por %p247_p0, %p246_p13 }
  0x38   :  { %s332_s30 = smov (!%p100_p8, %s176_s30), 0  ;;  %p111_p10 = scmp.gt.s32.totalorder %s182_s4, 0 }
  0x39   :  { %p183_p11 = scmp.lt.s32.totalorder %s182_s4, 19  ;;  %s334_s30 = smov (!%p177_p9, %s332_s30), 19 }
  0x3a   :  { %s336_s4 = smov (!%p111_p10, %s182_s4), 0  ;;  %s104_s8 = scalar_lea.vmem [#allocation4], %s334_s30 }
  0x3b   :  { %v105_v6 = vld [vmem:[%s104_s8] sm:$0x1]  ;;  %s338_s4 = smov (!%p183_p11, %s336_s4), 19  ;;  %p249_p2 = pnand %p248_p1, %p242_p12 }
  0x3c   :  { %106 = vst [vmem:[#allocation7 + $0x6] sm:$0x1] %v105_v6  ;;  %s115_s9 = scalar_lea.vmem [#allocation4], %s338_s4 }
  0x3d   :  { %v116_v7 = vld [vmem:[%s115_s9] sm:$0x1] }
  0x3e   :  { %117 = vst [vmem:[#allocation7 + $0x7] sm:$0x1] %v116_v7 }
  0x3f   :  { %252 = shalt.err (!%p249_p2)
}
  0x40   :  { %127 = dma.vmem_to_hbm [thread:$0]  %s125_s7, 128, %s308_s2, [#allocation6]  }
  0x41   :  { %265 = dma.done.wait [#allocation6], 128  }
  0x42   :  { %266 = vsyncadd [#allocation6], 4294967168 }
  0x43   :  { %131 = vsyncpa [#allocation5], 1 }
  0x44   :  { %132 = vsyncpa [#allocation6], 1 }

</bundles_post_ra>
